<compile_context>
chip_gen: v7x
topology: tpu7x:2x2x1
jax: 0.10.0
libtpu: 0.0.40
codegen_flags: <defaults>
</compile_context>

<pallas_src>
import math

import jax
import jax.numpy as jnp
from jax.experimental import pallas as pl
from jax.experimental.pallas import tpu as pltpu

# ---- toy config (mirrors get_config()) ----
N_EMBD = 32
N_HEAD = 4
HEAD_DIM = N_EMBD // N_HEAD          # 8
N_LAYER = 2
BLOCK_SIZE = 16
VOCAB_SIZE = 128                     # multiple of 128 -> lane-dense lm_head output
MLP_SIZE_FACTOR = 4
HIDDEN = MLP_SIZE_FACTOR * N_EMBD    # 128
DROPOUT = 0.0                        # TODO(synk): training-mode dropout not implemented (identity)
LN_EPS = 1e-5

_INV_SQRT2 = 0.7071067811865476      # 1/sqrt(2) precomputed (multiply, not divide)


def _layernorm(x, w, b):
    mu = jnp.mean(x, axis=-1, keepdims=True)
    xc = x - mu
    var = jnp.mean(xc * xc, axis=-1, keepdims=True)
    return xc * jax.lax.rsqrt(var + LN_EPS) * w + b


def _gelu_erf(x):
    # exact GELU (matches nn.GELU() default, erf-based)
    return 0.5 * x * (1.0 + jax.lax.erf(x * _INV_SQRT2))


# --------------------------------------------------------------------------
# Fused transformer Block kernel: LN1 -> causal MHA -> +res -> LN2 -> MLP -> +res
# One grid step = one batch element's full (T, D) sequence.
# --------------------------------------------------------------------------
def block_kernel(x_ref, ln1w_ref, ln1b_ref, wqkv_ref, bqkv_ref,
                 wproj_ref, bproj_ref, ln2w_ref, ln2b_ref,
                 w1_ref, b1_ref, w2_ref, b2_ref, o_ref):
    x = x_ref[0]                                   # (T, D)
    T, D = x.shape

    # ---- LN1 + fused QKV projection ----
    xn = _layernorm(x, ln1w_ref[...], ln1b_ref[...])
    qkv = jnp.dot(xn, wqkv_ref[...],
                  preferred_element_type=jnp.float32) + bqkv_ref[...]   # (T, 3D)

    # ---- causal multi-head attention ----
    scale = 1.0 / math.sqrt(HEAD_DIM)
    row = jax.lax.broadcasted_iota(jnp.int32, (T, T), 0)
    col = jax.lax.broadcasted_iota(jnp.int32, (T, T), 1)
    causal = row >= col
    wproj = wproj_ref[...]                         # (D, D); sublane-aligned slices below
    y = jnp.zeros((T, D), jnp.float32)
    for h in range(N_HEAD):
        lo = h * HEAD_DIM
        qh = qkv[:, lo:lo + HEAD_DIM]
        kh = qkv[:, D + lo:D + lo + HEAD_DIM]
        vh = qkv[:, 2 * D + lo:2 * D + lo + HEAD_DIM]
        s = jax.lax.dot_general(qh, kh, (((1,), (1,)), ((), ())),
                                preferred_element_type=jnp.float32) * scale
        s = jnp.where(causal, s, -1e30)
        s = s - jnp.max(s, axis=-1, keepdims=True)
        p = jnp.exp(s)
        p = p / jnp.sum(p, axis=-1, keepdims=True)
        yh = jnp.dot(p, vh, preferred_element_type=jnp.float32)          # (T, hd)
        # accumulate this head's slice of the output projection (avoids concat)
        y = y + jnp.dot(yh, wproj[lo:lo + HEAD_DIM, :],
                        preferred_element_type=jnp.float32)
    x1 = x + y + bproj_ref[...]

    # ---- LN2 + MLP + residual ----
    xn2 = _layernorm(x1, ln2w_ref[...], ln2b_ref[...])
    hdn = jnp.dot(xn2, w1_ref[...], preferred_element_type=jnp.float32) + b1_ref[...]
    hdn = _gelu_erf(hdn)
    mlp = jnp.dot(hdn, w2_ref[...], preferred_element_type=jnp.float32) + b2_ref[...]
    o_ref[0] = (x1 + mlp).astype(o_ref.dtype)


def transformer_block(x, p):
    B, T, D = x.shape
    H = HIDDEN
    full = lambda b: (0, 0)
    return pl.pallas_call(
        block_kernel,
        out_shape=jax.ShapeDtypeStruct((B, T, D), x.dtype),
        grid_spec=pltpu.PrefetchScalarGridSpec(
            num_scalar_prefetch=0,
            grid=(B,),
            in_specs=[
                pl.BlockSpec((1, T, D), lambda b: (b, 0, 0)),   # x (per batch)
                pl.BlockSpec((1, D), full),                     # ln1_w
                pl.BlockSpec((1, D), full),                     # ln1_b
                pl.BlockSpec((D, 3 * D), full),                 # wqkv
                pl.BlockSpec((1, 3 * D), full),                 # bqkv
                pl.BlockSpec((D, D), full),                     # wproj
                pl.BlockSpec((1, D), full),                     # bproj
                pl.BlockSpec((1, D), full),                     # ln2_w
                pl.BlockSpec((1, D), full),                     # ln2_b
                pl.BlockSpec((D, H), full),                     # w1 (c_fc)
                pl.BlockSpec((1, H), full),                     # b1
                pl.BlockSpec((H, D), full),                     # w2 (c_proj)
                pl.BlockSpec((1, D), full),                     # b2
            ],
            out_specs=pl.BlockSpec((1, T, D), lambda b: (b, 0, 0)),
        ),
        compiler_params=pltpu.CompilerParams(
            dimension_semantics=("parallel",)),
    )(x,
      p['ln1_w'].reshape(1, D), p['ln1_b'].reshape(1, D),
      p['wqkv'], p['bqkv'].reshape(1, 3 * D),
      p['wproj'], p['bproj'].reshape(1, D),
      p['ln2_w'].reshape(1, D), p['ln2_b'].reshape(1, D),
      p['w1'], p['b1'].reshape(1, H),
      p['w2'], p['b2'].reshape(1, D))


# --------------------------------------------------------------------------
# Fused final LayerNorm + (weight-tied) lm_head kernel.  Output block is
# (tm, VOCAB=128): lane-dense, unmasked stores.
# --------------------------------------------------------------------------
def lnf_head_kernel(x_ref, lnw_ref, lnb_ref, wh_ref, o_ref):
    x = x_ref[...]
    xn = _layernorm(x, lnw_ref[...], lnb_ref[...])
    o_ref[...] = jnp.dot(xn, wh_ref[...],
                         preferred_element_type=jnp.float32).astype(o_ref.dtype)


def lnf_lm_head(x2d, lnw, lnb, w_head):
    M, D = x2d.shape
    V = w_head.shape[1]
    # >=2 parallel grid steps when row count allows (v7x has 2 TensorCores),
    # otherwise one full-array step.
    tm = M // 2 if (M % 2 == 0 and (M // 2) % 8 == 0) else M
    return pl.pallas_call(
        lnf_head_kernel,
        out_shape=jax.ShapeDtypeStruct((M, V), x2d.dtype),
        grid_spec=pltpu.PrefetchScalarGridSpec(
            num_scalar_prefetch=0,
            grid=(M // tm,),
            in_specs=[
                pl.BlockSpec((tm, D), lambda i: (i, 0)),
                pl.BlockSpec((1, D), lambda i: (0, 0)),
                pl.BlockSpec((1, D), lambda i: (0, 0)),
                pl.BlockSpec((D, V), lambda i: (0, 0)),
            ],
            out_specs=pl.BlockSpec((tm, V), lambda i: (i, 0)),
        ),
        compiler_params=pltpu.CompilerParams(
            dimension_semantics=("parallel",)),
    )(x2d, lnw.reshape(1, D), lnb.reshape(1, D), w_head)


# --------------------------------------------------------------------------
# Full GPT forward (eval mode, dropout identity).
# --------------------------------------------------------------------------
def gpt_forward(idx, params):
    B, T = idx.shape
    assert T <= BLOCK_SIZE
    # TODO(synk): embedding gathers (wte[idx] + wpe[pos]) run in plain XLA, not Pallas.
    x = params['wte'][idx] + params['wpe'][jnp.arange(T)]
    # drop(p=0.0) == identity
    for p in params['blocks']:
        x = transformer_block(x, p)
    x2d = x.reshape(B * T, N_EMBD)
    logits = lnf_lm_head(x2d, params['lnf_w'], params['lnf_b'],
                         params['wte'].T)      # weight tying: lm_head.weight = wte
    return logits.reshape(B, T, VOCAB_SIZE)


# --------------------------------------------------------------------------
# Pure-JAX reference (mirrors the PyTorch forward semantics).
# --------------------------------------------------------------------------
def gpt_reference(idx, params):
    B, T = idx.shape
    x = params['wte'][idx] + params['wpe'][jnp.arange(T)]
    for p in params['blocks']:
        xn = _layernorm(x, p['ln1_w'], p['ln1_b'])
        qkv = xn @ p['wqkv'] + p['bqkv']
        q, k, v = jnp.split(qkv, 3, axis=-1)
        q = q.reshape(B, T, N_HEAD, HEAD_DIM).transpose(0, 2, 1, 3)
        k = k.reshape(B, T, N_HEAD, HEAD_DIM).transpose(0, 2, 1, 3)
        v = v.reshape(B, T, N_HEAD, HEAD_DIM).transpose(0, 2, 1, 3)
        att = jnp.einsum('bhtd,bhsd->bhts', q, k) * (1.0 / math.sqrt(HEAD_DIM))
        mask = jnp.tril(jnp.ones((T, T), bool))
        att = jnp.where(mask, att, -jnp.inf)
        att = jax.nn.softmax(att, axis=-1)
        y = jnp.einsum('bhts,bhsd->bhtd', att, v)
        y = y.transpose(0, 2, 1, 3).reshape(B, T, N_EMBD)
        x = x + y @ p['wproj'] + p['bproj']
        xn2 = _layernorm(x, p['ln2_w'], p['ln2_b'])
        h = _gelu_erf(xn2 @ p['w1'] + p['b1'])
        x = x + h @ p['w2'] + p['b2']
    x = _layernorm(x, params['lnf_w'], params['lnf_b'])
    return x @ params['wte'].T


def init_params(key):
    D, H, V = N_EMBD, HIDDEN, VOCAB_SIZE
    keys = jax.random.split(key, 4 + N_LAYER)
    proj_std = 0.02 / math.sqrt(2 * N_LAYER)
    params = {
        'wte': 0.02 * jax.random.normal(keys[0], (V, D), jnp.float32),
        'wpe': 0.02 * jax.random.normal(keys[1], (BLOCK_SIZE, D), jnp.float32),
        'lnf_w': 1.0 + 0.1 * jax.random.normal(keys[2], (D,), jnp.float32),
        'lnf_b': 0.1 * jax.random.normal(keys[3], (D,), jnp.float32),
        'blocks': [],
    }
    for l in range(N_LAYER):
        bk = jax.random.split(keys[4 + l], 12)
        params['blocks'].append(dict(
            ln1_w=1.0 + 0.1 * jax.random.normal(bk[0], (D,), jnp.float32),
            ln1_b=0.1 * jax.random.normal(bk[1], (D,), jnp.float32),
            wqkv=0.02 * jax.random.normal(bk[2], (D, 3 * D), jnp.float32),
            bqkv=0.01 * jax.random.normal(bk[3], (3 * D,), jnp.float32),
            wproj=proj_std * jax.random.normal(bk[4], (D, D), jnp.float32),
            bproj=0.01 * jax.random.normal(bk[5], (D,), jnp.float32),
            ln2_w=1.0 + 0.1 * jax.random.normal(bk[6], (D,), jnp.float32),
            ln2_b=0.1 * jax.random.normal(bk[7], (D,), jnp.float32),
            w1=0.02 * jax.random.normal(bk[8], (D, H), jnp.float32),
            b1=0.01 * jax.random.normal(bk[9], (H,), jnp.float32),
            w2=proj_std * jax.random.normal(bk[10], (H, D), jnp.float32),
            b2=0.01 * jax.random.normal(bk[11], (D,), jnp.float32),
        ))
    return params


if __name__ == "__main__":
    key = jax.random.PRNGKey(0)
    kp, ki = jax.random.split(key)
    params = init_params(kp)

    B, T = 2, 8
    idx = jax.random.randint(ki, (B, T), 0, VOCAB_SIZE)

    logits = gpt_forward(idx, params)
    logits = jax.block_until_ready(logits)

    ref = gpt_reference(idx, params)
    assert logits.shape == (B, T, VOCAB_SIZE)
    max_err = float(jnp.max(jnp.abs(logits - ref)))
    assert jnp.allclose(logits, ref, atol=1e-4, rtol=1e-4), max_err
    print("KERNEL_OK")
</pallas_src>

<mosaic_0001>
module attributes {stable_mosaic.version = 11 : i64} {
  func.func @block_kernel(%arg0: i32, %arg1: memref<1x8x32xf32, #tpu.memory_space<vmem>>, %arg2: memref<1x32xf32, #tpu.memory_space<vmem>>, %arg3: memref<1x32xf32, #tpu.memory_space<vmem>>, %arg4: memref<32x96xf32, #tpu.memory_space<vmem>>, %arg5: memref<1x96xf32, #tpu.memory_space<vmem>>, %arg6: memref<32x32xf32, #tpu.memory_space<vmem>>, %arg7: memref<1x32xf32, #tpu.memory_space<vmem>>, %arg8: memref<1x32xf32, #tpu.memory_space<vmem>>, %arg9: memref<1x32xf32, #tpu.memory_space<vmem>>, %arg10: memref<32x128xf32, #tpu.memory_space<vmem>>, %arg11: memref<1x128xf32, #tpu.memory_space<vmem>>, %arg12: memref<128x32xf32, #tpu.memory_space<vmem>>, %arg13: memref<1x32xf32, #tpu.memory_space<vmem>>, %arg14: memref<1x8x32xf32, #tpu.memory_space<vmem>>) attributes {dimension_semantics = [#tpu.dimension_semantics<parallel>], iteration_bounds = array<i64: 2>, scalar_prefetch = 0 : i64, scratch_operands = 0 : i64, tpu.core_type = #tpu.core_type<tc>, window_params = [{transform_indices = @transform_0, window_bounds = array<i64: 1, 8, 32>}, {pipeline_mode = #tpu.pipeline_mode<synchronous>, transform_indices = @transform_1, window_bounds = array<i64: 1, 32>}, {pipeline_mode = #tpu.pipeline_mode<synchronous>, transform_indices = @transform_2, window_bounds = array<i64: 1, 32>}, {pipeline_mode = #tpu.pipeline_mode<synchronous>, transform_indices = @transform_3, window_bounds = array<i64: 32, 96>}, {pipeline_mode = #tpu.pipeline_mode<synchronous>, transform_indices = @transform_4, window_bounds = array<i64: 1, 96>}, {pipeline_mode = #tpu.pipeline_mode<synchronous>, transform_indices = @transform_5, window_bounds = array<i64: 32, 32>}, {pipeline_mode = #tpu.pipeline_mode<synchronous>, transform_indices = @transform_6, window_bounds = array<i64: 1, 32>}, {pipeline_mode = #tpu.pipeline_mode<synchronous>, transform_indices = @transform_7, window_bounds = array<i64: 1, 32>}, {pipeline_mode = #tpu.pipeline_mode<synchronous>, transform_indices = @transform_8, window_bounds = array<i64: 1, 32>}, {pipeline_mode = #tpu.pipeline_mode<synchronous>, transform_indices = @transform_9, window_bounds = array<i64: 32, 128>}, {pipeline_mode = #tpu.pipeline_mode<synchronous>, transform_indices = @transform_10, window_bounds = array<i64: 1, 128>}, {pipeline_mode = #tpu.pipeline_mode<synchronous>, transform_indices = @transform_11, window_bounds = array<i64: 128, 32>}, {pipeline_mode = #tpu.pipeline_mode<synchronous>, transform_indices = @transform_12, window_bounds = array<i64: 1, 32>}, {transform_indices = @transform_13, window_bounds = array<i64: 1, 8, 32>}]} {
    %c0 = arith.constant 0 : index
    %c0_0 = arith.constant 0 : index
    %c0_1 = arith.constant 0 : index
    %0 = vector.load %arg1[%c0, %c0_0, %c0_1] : memref<1x8x32xf32, #tpu.memory_space<vmem>>, vector<1x8x32xf32>
    %1 = vector.shape_cast %0 : vector<1x8x32xf32> to vector<8x32xf32>
    %c0_2 = arith.constant 0 : index
    %c0_3 = arith.constant 0 : index
    %2 = vector.load %arg2[%c0_2, %c0_3] : memref<1x32xf32, #tpu.memory_space<vmem>>, vector<1x32xf32>
    %c0_4 = arith.constant 0 : index
    %c0_5 = arith.constant 0 : index
    %3 = vector.load %arg3[%c0_4, %c0_5] : memref<1x32xf32, #tpu.memory_space<vmem>>, vector<1x32xf32>
    %cst = arith.constant dense<0.000000e+00> : vector<8xf32>
    %4 = vector.multi_reduction <add>, %1, %cst [1] : vector<8x32xf32> to vector<8xf32>
    %5 = vector.shape_cast %4 : vector<8xf32> to vector<8x1xf32>
    %cst_6 = arith.constant 3.200000e+01 : f32
    %6 = vector.broadcast %cst_6 : f32 to vector<8x1xf32>
    %7 = arith.divf %5, %6 : vector<8x1xf32>
    %8 = vector.broadcast %7 : vector<8x1xf32> to vector<8x32xf32>
    %9 = arith.subf %1, %8 : vector<8x32xf32>
    %10 = arith.mulf %9, %9 : vector<8x32xf32>
    %cst_7 = arith.constant dense<0.000000e+00> : vector<8xf32>
    %11 = vector.multi_reduction <add>, %10, %cst_7 [1] : vector<8x32xf32> to vector<8xf32>
    %12 = vector.shape_cast %11 : vector<8xf32> to vector<8x1xf32>
    %cst_8 = arith.constant 3.200000e+01 : f32
    %13 = vector.broadcast %cst_8 : f32 to vector<8x1xf32>
    %14 = arith.divf %12, %13 : vector<8x1xf32>
    %cst_9 = arith.constant 9.99999974E-6 : f32
    %15 = vector.broadcast %cst_9 : f32 to vector<8x1xf32>
    %16 = arith.addf %14, %15 : vector<8x1xf32>
    %17 = math.rsqrt %16 : vector<8x1xf32>
    %18 = vector.broadcast %17 : vector<8x1xf32> to vector<8x32xf32>
    %19 = arith.mulf %9, %18 : vector<8x32xf32>
    %20 = vector.broadcast %2 : vector<1x32xf32> to vector<8x32xf32>
    %21 = arith.mulf %19, %20 : vector<8x32xf32>
    %22 = vector.broadcast %3 : vector<1x32xf32> to vector<8x32xf32>
    %23 = arith.addf %21, %22 : vector<8x32xf32>
    %c0_10 = arith.constant 0 : index
    %c0_11 = arith.constant 0 : index
    %24 = vector.load %arg4[%c0_10, %c0_11] : memref<32x96xf32, #tpu.memory_space<vmem>>, vector<32x96xf32>
    %cst_12 = arith.constant dense<0.000000e+00> : vector<8x96xf32>
    %25 = tpu.matmul %23, %24, %cst_12 {dimension_numbers = #tpu.dot_dimension_numbers<[1], [0], [0], [1], [0, 0, 1, 1], [], []>} : vector<8x32xf32>, vector<32x96xf32>, vector<8x96xf32> -> vector<8x96xf32>
    %c0_13 = arith.constant 0 : index
    %c0_14 = arith.constant 0 : index
    %26 = vector.load %arg5[%c0_13, %c0_14] : memref<1x96xf32, #tpu.memory_space<vmem>>, vector<1x96xf32>
    %27 = vector.broadcast %26 : vector<1x96xf32> to vector<8x96xf32>
    %28 = arith.addf %25, %27 : vector<8x96xf32>
    %29 = tpu.iota {dimensions = array<i32: 0>} : vector<8x8xi32>
    %30 = tpu.iota {dimensions = array<i32: 1>} : vector<8x8xi32>
    %31 = arith.cmpi sge, %29, %30 : vector<8x8xi32>
    %c0_15 = arith.constant 0 : index
    %c0_16 = arith.constant 0 : index
    %32 = vector.load %arg6[%c0_15, %c0_16] : memref<32x32xf32, #tpu.memory_space<vmem>>, vector<32x32xf32>
    %cst_17 = arith.constant 0.000000e+00 : f32
    %33 = vector.broadcast %cst_17 : f32 to vector<8x32xf32>
    %34 = vector.extract_strided_slice %28 {offsets = [0, 0], sizes = [8, 8], strides = [1, 1]} : vector<8x96xf32> to vector<8x8xf32>
    %35 = vector.extract_strided_slice %28 {offsets = [0, 32], sizes = [8, 8], strides = [1, 1]} : vector<8x96xf32> to vector<8x8xf32>
    %36 = vector.extract_strided_slice %28 {offsets = [0, 64], sizes = [8, 8], strides = [1, 1]} : vector<8x96xf32> to vector<8x8xf32>
    %cst_18 = arith.constant dense<0.000000e+00> : vector<8x8xf32>
    %37 = tpu.matmul %34, %35, %cst_18 {dimension_numbers = #tpu.dot_dimension_numbers<[1], [1], [0], [0], [0, 0, 1, 0], [], []>} : vector<8x8xf32>, vector<8x8xf32>, vector<8x8xf32> -> vector<8x8xf32>
    %cst_19 = arith.constant 0.353553385 : f32
    %38 = vector.broadcast %cst_19 : f32 to vector<8x8xf32>
    %39 = arith.mulf %37, %38 : vector<8x8xf32>
    %cst_20 = arith.constant -1.000000e+30 : f32
    %40 = vector.broadcast %cst_20 : f32 to vector<8x8xf32>
    %41 = arith.select %31, %39, %40 : vector<8x8xi1>, vector<8x8xf32>
    %cst_21 = arith.constant dense<0xFF800000> : vector<8xf32>
    %42 = vector.multi_reduction <maximumf>, %41, %cst_21 [1] : vector<8x8xf32> to vector<8xf32>
    %43 = vector.shape_cast %42 : vector<8xf32> to vector<8x1xf32>
    %44 = vector.broadcast %43 : vector<8x1xf32> to vector<8x8xf32>
    %45 = arith.subf %41, %44 : vector<8x8xf32>
    %46 = math.exp %45 : vector<8x8xf32>
    %cst_22 = arith.constant dense<0.000000e+00> : vector<8xf32>
    %47 = vector.multi_reduction <add>, %46, %cst_22 [1] : vector<8x8xf32> to vector<8xf32>
    %48 = vector.shape_cast %47 : vector<8xf32> to vector<8x1xf32>
    %49 = vector.broadcast %48 : vector<8x1xf32> to vector<8x8xf32>
    %50 = arith.divf %46, %49 : vector<8x8xf32>
    %cst_23 = arith.constant dense<0.000000e+00> : vector<8x8xf32>
    %51 = tpu.matmul %50, %36, %cst_23 {dimension_numbers = #tpu.dot_dimension_numbers<[1], [0], [0], [1], [0, 0, 1, 1], [], []>} : vector<8x8xf32>, vector<8x8xf32>, vector<8x8xf32> -> vector<8x8xf32>
    %52 = vector.extract_strided_slice %32 {offsets = [0, 0], sizes = [8, 32], strides = [1, 1]} : vector<32x32xf32> to vector<8x32xf32>
    %cst_24 = arith.constant dense<0.000000e+00> : vector<8x32xf32>
    %53 = tpu.matmul %51, %52, %cst_24 {dimension_numbers = #tpu.dot_dimension_numbers<[1], [0], [0], [1], [0, 0, 1, 1], [], []>} : vector<8x8xf32>, vector<8x32xf32>, vector<8x32xf32> -> vector<8x32xf32>
    %54 = arith.addf %33, %53 : vector<8x32xf32>
    %55 = vector.extract_strided_slice %28 {offsets = [0, 8], sizes = [8, 8], strides = [1, 1]} : vector<8x96xf32> to vector<8x8xf32>
    %56 = vector.extract_strided_slice %28 {offsets = [0, 40], sizes = [8, 8], strides = [1, 1]} : vector<8x96xf32> to vector<8x8xf32>
    %57 = vector.extract_strided_slice %28 {offsets = [0, 72], sizes = [8, 8], strides = [1, 1]} : vector<8x96xf32> to vector<8x8xf32>
    %cst_25 = arith.constant dense<0.000000e+00> : vector<8x8xf32>
    %58 = tpu.matmul %55, %56, %cst_25 {dimension_numbers = #tpu.dot_dimension_numbers<[1], [1], [0], [0], [0, 0, 1, 0], [], []>} : vector<8x8xf32>, vector<8x8xf32>, vector<8x8xf32> -> vector<8x8xf32>
    %cst_26 = arith.constant 0.353553385 : f32
    %59 = vector.broadcast %cst_26 : f32 to vector<8x8xf32>
    %60 = arith.mulf %58, %59 : vector<8x8xf32>
    %cst_27 = arith.constant -1.000000e+30 : f32
    %61 = vector.broadcast %cst_27 : f32 to vector<8x8xf32>
    %62 = arith.select %31, %60, %61 : vector<8x8xi1>, vector<8x8xf32>
    %cst_28 = arith.constant dense<0xFF800000> : vector<8xf32>
    %63 = vector.multi_reduction <maximumf>, %62, %cst_28 [1] : vector<8x8xf32> to vector<8xf32>
    %64 = vector.shape_cast %63 : vector<8xf32> to vector<8x1xf32>
    %65 = vector.broadcast %64 : vector<8x1xf32> to vector<8x8xf32>
    %66 = arith.subf %62, %65 : vector<8x8xf32>
    %67 = math.exp %66 : vector<8x8xf32>
    %cst_29 = arith.constant dense<0.000000e+00> : vector<8xf32>
    %68 = vector.multi_reduction <add>, %67, %cst_29 [1] : vector<8x8xf32> to vector<8xf32>
    %69 = vector.shape_cast %68 : vector<8xf32> to vector<8x1xf32>
    %70 = vector.broadcast %69 : vector<8x1xf32> to vector<8x8xf32>
    %71 = arith.divf %67, %70 : vector<8x8xf32>
    %cst_30 = arith.constant dense<0.000000e+00> : vector<8x8xf32>
    %72 = tpu.matmul %71, %57, %cst_30 {dimension_numbers = #tpu.dot_dimension_numbers<[1], [0], [0], [1], [0, 0, 1, 1], [], []>} : vector<8x8xf32>, vector<8x8xf32>, vector<8x8xf32> -> vector<8x8xf32>
    %73 = vector.extract_strided_slice %32 {offsets = [8, 0], sizes = [8, 32], strides = [1, 1]} : vector<32x32xf32> to vector<8x32xf32>
    %cst_31 = arith.constant dense<0.000000e+00> : vector<8x32xf32>
    %74 = tpu.matmul %72, %73, %cst_31 {dimension_numbers = #tpu.dot_dimension_numbers<[1], [0], [0], [1], [0, 0, 1, 1], [], []>} : vector<8x8xf32>, vector<8x32xf32>, vector<8x32xf32> -> vector<8x32xf32>
    %75 = arith.addf %54, %74 : vector<8x32xf32>
    %76 = vector.extract_strided_slice %28 {offsets = [0, 16], sizes = [8, 8], strides = [1, 1]} : vector<8x96xf32> to vector<8x8xf32>
    %77 = vector.extract_strided_slice %28 {offsets = [0, 48], sizes = [8, 8], strides = [1, 1]} : vector<8x96xf32> to vector<8x8xf32>
    %78 = vector.extract_strided_slice %28 {offsets = [0, 80], sizes = [8, 8], strides = [1, 1]} : vector<8x96xf32> to vector<8x8xf32>
    %cst_32 = arith.constant dense<0.000000e+00> : vector<8x8xf32>
    %79 = tpu.matmul %76, %77, %cst_32 {dimension_numbers = #tpu.dot_dimension_numbers<[1], [1], [0], [0], [0, 0, 1, 0], [], []>} : vector<8x8xf32>, vector<8x8xf32>, vector<8x8xf32> -> vector<8x8xf32>
    %cst_33 = arith.constant 0.353553385 : f32
    %80 = vector.broadcast %cst_33 : f32 to vector<8x8xf32>
    %81 = arith.mulf %79, %80 : vector<8x8xf32>
    %cst_34 = arith.constant -1.000000e+30 : f32
    %82 = vector.broadcast %cst_34 : f32 to vector<8x8xf32>
    %83 = arith.select %31, %81, %82 : vector<8x8xi1>, vector<8x8xf32>
    %cst_35 = arith.constant dense<0xFF800000> : vector<8xf32>
    %84 = vector.multi_reduction <maximumf>, %83, %cst_35 [1] : vector<8x8xf32> to vector<8xf32>
    %85 = vector.shape_cast %84 : vector<8xf32> to vector<8x1xf32>
    %86 = vector.broadcast %85 : vector<8x1xf32> to vector<8x8xf32>
    %87 = arith.subf %83, %86 : vector<8x8xf32>
    %88 = math.exp %87 : vector<8x8xf32>
    %cst_36 = arith.constant dense<0.000000e+00> : vector<8xf32>
    %89 = vector.multi_reduction <add>, %88, %cst_36 [1] : vector<8x8xf32> to vector<8xf32>
    %90 = vector.shape_cast %89 : vector<8xf32> to vector<8x1xf32>
    %91 = vector.broadcast %90 : vector<8x1xf32> to vector<8x8xf32>
    %92 = arith.divf %88, %91 : vector<8x8xf32>
    %cst_37 = arith.constant dense<0.000000e+00> : vector<8x8xf32>
    %93 = tpu.matmul %92, %78, %cst_37 {dimension_numbers = #tpu.dot_dimension_numbers<[1], [0], [0], [1], [0, 0, 1, 1], [], []>} : vector<8x8xf32>, vector<8x8xf32>, vector<8x8xf32> -> vector<8x8xf32>
    %94 = vector.extract_strided_slice %32 {offsets = [16, 0], sizes = [8, 32], strides = [1, 1]} : vector<32x32xf32> to vector<8x32xf32>
    %cst_38 = arith.constant dense<0.000000e+00> : vector<8x32xf32>
    %95 = tpu.matmul %93, %94, %cst_38 {dimension_numbers = #tpu.dot_dimension_numbers<[1], [0], [0], [1], [0, 0, 1, 1], [], []>} : vector<8x8xf32>, vector<8x32xf32>, vector<8x32xf32> -> vector<8x32xf32>
    %96 = arith.addf %75, %95 : vector<8x32xf32>
    %97 = vector.extract_strided_slice %28 {offsets = [0, 24], sizes = [8, 8], strides = [1, 1]} : vector<8x96xf32> to vector<8x8xf32>
    %98 = vector.extract_strided_slice %28 {offsets = [0, 56], sizes = [8, 8], strides = [1, 1]} : vector<8x96xf32> to vector<8x8xf32>
    %99 = vector.extract_strided_slice %28 {offsets = [0, 88], sizes = [8, 8], strides = [1, 1]} : vector<8x96xf32> to vector<8x8xf32>
    %cst_39 = arith.constant dense<0.000000e+00> : vector<8x8xf32>
    %100 = tpu.matmul %97, %98, %cst_39 {dimension_numbers = #tpu.dot_dimension_numbers<[1], [1], [0], [0], [0, 0, 1, 0], [], []>} : vector<8x8xf32>, vector<8x8xf32>, vector<8x8xf32> -> vector<8x8xf32>
    %cst_40 = arith.constant 0.353553385 : f32
    %101 = vector.broadcast %cst_40 : f32 to vector<8x8xf32>
    %102 = arith.mulf %100, %101 : vector<8x8xf32>
    %cst_41 = arith.constant -1.000000e+30 : f32
    %103 = vector.broadcast %cst_41 : f32 to vector<8x8xf32>
    %104 = arith.select %31, %102, %103 : vector<8x8xi1>, vector<8x8xf32>
    %cst_42 = arith.constant dense<0xFF800000> : vector<8xf32>
    %105 = vector.multi_reduction <maximumf>, %104, %cst_42 [1] : vector<8x8xf32> to vector<8xf32>
    %106 = vector.shape_cast %105 : vector<8xf32> to vector<8x1xf32>
    %107 = vector.broadcast %106 : vector<8x1xf32> to vector<8x8xf32>
    %108 = arith.subf %104, %107 : vector<8x8xf32>
    %109 = math.exp %108 : vector<8x8xf32>
    %cst_43 = arith.constant dense<0.000000e+00> : vector<8xf32>
    %110 = vector.multi_reduction <add>, %109, %cst_43 [1] : vector<8x8xf32> to vector<8xf32>
    %111 = vector.shape_cast %110 : vector<8xf32> to vector<8x1xf32>
    %112 = vector.broadcast %111 : vector<8x1xf32> to vector<8x8xf32>
    %113 = arith.divf %109, %112 : vector<8x8xf32>
    %cst_44 = arith.constant dense<0.000000e+00> : vector<8x8xf32>
    %114 = tpu.matmul %113, %99, %cst_44 {dimension_numbers = #tpu.dot_dimension_numbers<[1], [0], [0], [1], [0, 0, 1, 1], [], []>} : vector<8x8xf32>, vector<8x8xf32>, vector<8x8xf32> -> vector<8x8xf32>
    %115 = vector.extract_strided_slice %32 {offsets = [24, 0], sizes = [8, 32], strides = [1, 1]} : vector<32x32xf32> to vector<8x32xf32>
    %cst_45 = arith.constant dense<0.000000e+00> : vector<8x32xf32>
    %116 = tpu.matmul %114, %115, %cst_45 {dimension_numbers = #tpu.dot_dimension_numbers<[1], [0], [0], [1], [0, 0, 1, 1], [], []>} : vector<8x8xf32>, vector<8x32xf32>, vector<8x32xf32> -> vector<8x32xf32>
    %117 = arith.addf %96, %116 : vector<8x32xf32>
    %118 = arith.addf %1, %117 : vector<8x32xf32>
    %c0_46 = arith.constant 0 : index
    %c0_47 = arith.constant 0 : index
    %119 = vector.load %arg7[%c0_46, %c0_47] : memref<1x32xf32, #tpu.memory_space<vmem>>, vector<1x32xf32>
    %120 = vector.broadcast %119 : vector<1x32xf32> to vector<8x32xf32>
    %121 = arith.addf %118, %120 : vector<8x32xf32>
    %c0_48 = arith.constant 0 : index
    %c0_49 = arith.constant 0 : index
    %122 = vector.load %arg8[%c0_48, %c0_49] : memref<1x32xf32, #tpu.memory_space<vmem>>, vector<1x32xf32>
    %c0_50 = arith.constant 0 : index
    %c0_51 = arith.constant 0 : index
    %123 = vector.load %arg9[%c0_50, %c0_51] : memref<1x32xf32, #tpu.memory_space<vmem>>, vector<1x32xf32>
    %cst_52 = arith.constant dense<0.000000e+00> : vector<8xf32>
    %124 = vector.multi_reduction <add>, %121, %cst_52 [1] : vector<8x32xf32> to vector<8xf32>
    %125 = vector.shape_cast %124 : vector<8xf32> to vector<8x1xf32>
    %cst_53 = arith.constant 3.200000e+01 : f32
    %126 = vector.broadcast %cst_53 : f32 to vector<8x1xf32>
    %127 = arith.divf %125, %126 : vector<8x1xf32>
    %128 = vector.broadcast %127 : vector<8x1xf32> to vector<8x32xf32>
    %129 = arith.subf %121, %128 : vector<8x32xf32>
    %130 = arith.mulf %129, %129 : vector<8x32xf32>
    %cst_54 = arith.constant dense<0.000000e+00> : vector<8xf32>
    %131 = vector.multi_reduction <add>, %130, %cst_54 [1] : vector<8x32xf32> to vector<8xf32>
    %132 = vector.shape_cast %131 : vector<8xf32> to vector<8x1xf32>
    %cst_55 = arith.constant 3.200000e+01 : f32
    %133 = vector.broadcast %cst_55 : f32 to vector<8x1xf32>
    %134 = arith.divf %132, %133 : vector<8x1xf32>
    %cst_56 = arith.constant 9.99999974E-6 : f32
    %135 = vector.broadcast %cst_56 : f32 to vector<8x1xf32>
    %136 = arith.addf %134, %135 : vector<8x1xf32>
    %137 = math.rsqrt %136 : vector<8x1xf32>
    %138 = vector.broadcast %137 : vector<8x1xf32> to vector<8x32xf32>
    %139 = arith.mulf %129, %138 : vector<8x32xf32>
    %140 = vector.broadcast %122 : vector<1x32xf32> to vector<8x32xf32>
    %141 = arith.mulf %139, %140 : vector<8x32xf32>
    %142 = vector.broadcast %123 : vector<1x32xf32> to vector<8x32xf32>
    %143 = arith.addf %141, %142 : vector<8x32xf32>
    %c0_57 = arith.constant 0 : index
    %c0_58 = arith.constant 0 : index
    %144 = vector.load %arg10[%c0_57, %c0_58] : memref<32x128xf32, #tpu.memory_space<vmem>>, vector<32x128xf32>
    %cst_59 = arith.constant dense<0.000000e+00> : vector<8x128xf32>
    %145 = tpu.matmul %143, %144, %cst_59 {dimension_numbers = #tpu.dot_dimension_numbers<[1], [0], [0], [1], [0, 0, 1, 1], [], []>} : vector<8x32xf32>, vector<32x128xf32>, vector<8x128xf32> -> vector<8x128xf32>
    %c0_60 = arith.constant 0 : index
    %c0_61 = arith.constant 0 : index
    %146 = vector.load %arg11[%c0_60, %c0_61] : memref<1x128xf32, #tpu.memory_space<vmem>>, vector<1x128xf32>
    %147 = vector.broadcast %146 : vector<1x128xf32> to vector<8x128xf32>
    %148 = arith.addf %145, %147 : vector<8x128xf32>
    %cst_62 = arith.constant 5.000000e-01 : f32
    %149 = vector.broadcast %cst_62 : f32 to vector<8x128xf32>
    %150 = arith.mulf %149, %148 : vector<8x128xf32>
    %cst_63 = arith.constant 0.707106769 : f32
    %151 = vector.broadcast %cst_63 : f32 to vector<8x128xf32>
    %152 = arith.mulf %148, %151 : vector<8x128xf32>
    %153 = math.erf %152 : vector<8x128xf32>
    %cst_64 = arith.constant 1.000000e+00 : f32
    %154 = vector.broadcast %cst_64 : f32 to vector<8x128xf32>
    %155 = arith.addf %154, %153 : vector<8x128xf32>
    %156 = arith.mulf %150, %155 : vector<8x128xf32>
    %c0_65 = arith.constant 0 : index
    %c0_66 = arith.constant 0 : index
    %157 = vector.load %arg12[%c0_65, %c0_66] : memref<128x32xf32, #tpu.memory_space<vmem>>, vector<128x32xf32>
    %cst_67 = arith.constant dense<0.000000e+00> : vector<8x32xf32>
    %158 = tpu.matmul %156, %157, %cst_67 {dimension_numbers = #tpu.dot_dimension_numbers<[1], [0], [0], [1], [0, 0, 1, 1], [], []>} : vector<8x128xf32>, vector<128x32xf32>, vector<8x32xf32> -> vector<8x32xf32>
    %c0_68 = arith.constant 0 : index
    %c0_69 = arith.constant 0 : index
    %159 = vector.load %arg13[%c0_68, %c0_69] : memref<1x32xf32, #tpu.memory_space<vmem>>, vector<1x32xf32>
    %160 = vector.broadcast %159 : vector<1x32xf32> to vector<8x32xf32>
    %161 = arith.addf %158, %160 : vector<8x32xf32>
    %162 = arith.addf %121, %161 : vector<8x32xf32>
    %c0_70 = arith.constant 0 : index
    %c0_71 = arith.constant 0 : index
    %c0_72 = arith.constant 0 : index
    %163 = vector.load %arg14[%c0_70, %c0_71, %c0_72] : memref<1x8x32xf32, #tpu.memory_space<vmem>>, vector<1x8x32xf32>
    %164 = vector.shape_cast %163 : vector<1x8x32xf32> to vector<8x32xf32>
    %165 = vector.shape_cast %162 : vector<8x32xf32> to vector<1x8x32xf32>
    tpu.vector_store %arg14[%c0_70, %c0_71, %c0_72], %165 {strides = array<i32>} : memref<1x8x32xf32, #tpu.memory_space<vmem>>, vector<1x8x32xf32>,
    return
  }
  func.func @transform_0(%arg0: i32) -> (i32, i32, i32) {
    %c0_i32 = arith.constant 0 : i32
    %c0_i32_0 = arith.constant 0 : i32
    %c0_i32_1 = arith.constant 0 : i32
    return %arg0, %c0_i32, %c0_i32_0 : i32, i32, i32
  }
  func.func @transform_1(%arg0: i32) -> (i32, i32) {
    %c0_i32 = arith.constant 0 : i32
    %c0_i32_0 = arith.constant 0 : i32
    %c0_i32_1 = arith.constant 0 : i32
    return %c0_i32, %c0_i32_0 : i32, i32
  }
  func.func @transform_2(%arg0: i32) -> (i32, i32) {
    %c0_i32 = arith.constant 0 : i32
    %c0_i32_0 = arith.constant 0 : i32
    %c0_i32_1 = arith.constant 0 : i32
    return %c0_i32, %c0_i32_0 : i32, i32
  }
  func.func @transform_3(%arg0: i32) -> (i32, i32) {
    %c0_i32 = arith.constant 0 : i32
    %c0_i32_0 = arith.constant 0 : i32
    %c0_i32_1 = arith.constant 0 : i32
    return %c0_i32, %c0_i32_0 : i32, i32
  }
  func.func @transform_4(%arg0: i32) -> (i32, i32) {
    %c0_i32 = arith.constant 0 : i32
    %c0_i32_0 = arith.constant 0 : i32
    %c0_i32_1 = arith.constant 0 : i32
    return %c0_i32, %c0_i32_0 : i32, i32
  }
  func.func @transform_5(%arg0: i32) -> (i32, i32) {
    %c0_i32 = arith.constant 0 : i32
    %c0_i32_0 = arith.constant 0 : i32
    %c0_i32_1 = arith.constant 0 : i32
    return %c0_i32, %c0_i32_0 : i32, i32
  }
  func.func @transform_6(%arg0: i32) -> (i32, i32) {
    %c0_i32 = arith.constant 0 : i32
    %c0_i32_0 = arith.constant 0 : i32
    %c0_i32_1 = arith.constant 0 : i32
    return %c0_i32, %c0_i32_0 : i32, i32
  }
  func.func @transform_7(%arg0: i32) -> (i32, i32) {
    %c0_i32 = arith.constant 0 : i32
    %c0_i32_0 = arith.constant 0 : i32
    %c0_i32_1 = arith.constant 0 : i32
    return %c0_i32, %c0_i32_0 : i32, i32
  }
  func.func @transform_8(%arg0: i32) -> (i32, i32) {
    %c0_i32 = arith.constant 0 : i32
    %c0_i32_0 = arith.constant 0 : i32
    %c0_i32_1 = arith.constant 0 : i32
    return %c0_i32, %c0_i32_0 : i32, i32
  }
  func.func @transform_9(%arg0: i32) -> (i32, i32) {
    %c0_i32 = arith.constant 0 : i32
    %c0_i32_0 = arith.constant 0 : i32
    %c0_i32_1 = arith.constant 0 : i32
    return %c0_i32, %c0_i32_0 : i32, i32
  }
  func.func @transform_10(%arg0: i32) -> (i32, i32) {
    %c0_i32 = arith.constant 0 : i32
    %c0_i32_0 = arith.constant 0 : i32
    %c0_i32_1 = arith.constant 0 : i32
    return %c0_i32, %c0_i32_0 : i32, i32
  }
  func.func @transform_11(%arg0: i32) -> (i32, i32) {
    %c0_i32 = arith.constant 0 : i32
    %c0_i32_0 = arith.constant 0 : i32
    %c0_i32_1 = arith.constant 0 : i32
    return %c0_i32, %c0_i32_0 : i32, i32
  }
  func.func @transform_12(%arg0: i32) -> (i32, i32) {
    %c0_i32 = arith.constant 0 : i32
    %c0_i32_0 = arith.constant 0 : i32
    %c0_i32_1 = arith.constant 0 : i32
    return %c0_i32, %c0_i32_0 : i32, i32
  }
  func.func @transform_13(%arg0: i32) -> (i32, i32, i32) {
    %c0_i32 = arith.constant 0 : i32
    %c0_i32_0 = arith.constant 0 : i32
    %c0_i32_1 = arith.constant 0 : i32
    return %arg0, %c0_i32, %c0_i32_0 : i32, i32, i32
  }
}

</mosaic_0001>

<bundles_post_ra>
// kernel: tpu_custom_call.1
= control target key start
LH: loop header
LB: loop body
LE: loop exit
PB: predicated region body
PF: predicated region fallthrough
CT: control target
= control target key end

     0   :  { %s2617_s0 = inlined_call_operand.vmem [shape: f32[2,8,32], index: 0, kind: input, shape index: {}]   ;;  %s2618_s1 = inlined_call_operand.vmem [shape: f32[1,32], index: 1, kind: input, shape index: {}]   ;;  %s2619_s2 = inlined_call_operand.vmem [shape: f32[1,32], index: 2, kind: input, shape index: {}]   ;;  %s2620_s3 = inlined_call_operand.vmem [shape: f32[32,96], index: 3, kind: input, shape index: {}]   ;;  %s2621_s4 = inlined_call_operand.vmem [shape: f32[1,96], index: 4, kind: input, shape index: {}]   ;;  %s2622_s5 = inlined_call_operand.vmem [shape: f32[32,32], index: 5, kind: input, shape index: {}]   ;;  %s2623_s6 = inlined_call_operand.vmem [shape: f32[1,32], index: 6, kind: input, shape index: {}]   ;;  %s2624_s7 = inlined_call_operand.vmem [shape: f32[1,32], index: 7, kind: input, shape index: {}]   ;;  %s2625_s8 = inlined_call_operand.vmem [shape: f32[1,32], index: 8, kind: input, shape index: {}]   ;;  %s2626_s9 = inlined_call_operand.vmem [shape: f32[32,128], index: 9, kind: input, shape index: {}]   ;;  %s2627_s10 = inlined_call_operand.vmem [shape: f32[1,128], index: 10, kind: input, shape index: {}]   ;;  %s2628_s11 = inlined_call_operand.vmem [shape: f32[128,32], index: 11, kind: input, shape index: {}]   ;;  %s2629_s12 = inlined_call_operand.vmem [shape: f32[1,32], index: 12, kind: input, shape index: {}]   ;;  %s2630_s13 = inlined_call_operand.hbm [shape: f32[2,8,32], index: 13, kind: output, shape index: {}]  }
   0x1   :  { %2631 = sst [smem:[#allocation5_spill]] %s2617_s0 }
   0x2   :  { %2632 = sst [smem:[#allocation6_spill]] %s2618_s1 }
   0x3   :  { %2633 = sst [smem:[#allocation7_spill]] %s2619_s2 }
   0x4   :  { %18 = vsyncpa [#allocation3], 0 }
   0x5   :  { %20 = vsyncpa [#allocation3 + $0x1], 0  ;;  %s2282_s25 = smov 0   ;;  %s2284_s26 = smov 0  }
   0x6   :  { %s2286_s27 = smov 0   ;;  %s2288_s28 = smov 0  }
   0x7 LB: > { %s2303_s29 = sadd.s32 4294967295, %s2195_s28   ;;  %s1818_s30 = sadd.s32 4294967294, %s2195_s28   ;;  %s2195_s28 = sphi %s2288_s28, %s2642_s28   ;;  %s2191_s27 = sphi %s2286_s27, %s2641_s27   ;;  %s2187_s26 = sphi %s2284_s26, %s2640_s26   ;;  %s2183_s25 = sphi %s2282_s25, %s2639_s25  }
   0x8   : > { %s2307_s14 = sadd.s32 1, %s2195_s28   ;;  %s311_s15 = sadd.s32 1, %s2191_s27 }
   0x9   : > { %s308_s16 = ssub.s32 %s2195_s28, %s2307_s14  ;;  %p321_p0 = scmp.ne.s32.totalorder %s2191_s27, %s2187_s26 }
   0xa   : > { %p309_p1 = scmp.eq.s32.totalorder %s308_s16, 0  ;;  %p322_p2 = scmp.eq.s32.totalorder %s2303_s29, 1 }
   0xb   : > { %p327_p3 = scmp.ne.s32.totalorder %s2187_s26, %s2183_s25  ;;  %p328_p4 = scmp.eq.s32.totalorder %s1818_s30, 1 }
   0xc   : > { %s2318_s17 = scalar_select %p309_p1, %s2191_s27, %s311_s15  }
   0xd   : > { %p2320_p5 = por %p322_p2, %p321_p0  ;;  %p2324_p6 = por %p328_p4, %p327_p3 }
   0xe   : > { %p1821_p7 = scmp.ge.s32.totalorder %s2195_s28, 1  ;;  %p389_p8 = scmp.lt.s32.totalorder %s2195_s28, 3 }
  0x10   : > { %p390_p9 = pnand %p1821_p7, %p389_p8 }
  0x11   : > { %p432_p10 = scmp.lt.s32.totalorder (!%p390_p9), %s2303_s29, 1  ;;  %vm439_vm0 = vcmask (!%p390_p9), 261120   ;;  %s2636_s0 = sld [smem:[#allocation5_spill]] (!%p390_p9)  ;;  %v468_v7 = vld [vmem:[%s2620_s3] sm:$0xff] (!%p390_p9)  ;;  %v469_v8 = vld [vmem:[%s2620_s3 + $0x8] sm:$0xff] (!%p390_p9)  ;;  %v470_v9 = vld [vmem:[%s2620_s3 + $0x10] sm:$0xff] (!%p390_p9)  ;;  %v552_v30 = vlaneseq (!%p390_p9) }
  0x12   : > { %393 = sbr.rel (%p390_p9) target bundleno = 4219 (0x107b), region = 72  ;;  %v2197_v10 = vmov (!%p390_p9), 0.0|0.0   ;;  %v2023_v11 = vpack.c.bf16 (!%p390_p9), %v469_v8, %v468_v7  ;;  %v471_v12 = vld [vmem:[%s2620_s3 + $0x18] sm:$0xff] (!%p390_p9)  ;;  %vm2198_vm1 = vmmov (!%p390_p9), 0   ;;  %v2199_v13 = vmov (!%p390_p9), 0.0   ;;  %s2637_s1 = sld [smem:[#allocation6_spill]] (!%p390_p9) }
  0x13   : > { %2022 = vmatprep.subr.bf16.mxu0 (!%p390_p9), %v2197_v10  ;;  %1913 = vmatprep.mubr.msk.f32.mxu0 (!%p390_p9), %vm2198_vm1, %v2199_v13  ;;  %v2026_v14 = vpack.c.bf16 (!%p390_p9), %v471_v12, %v470_v9  ;;  %s2638_s2 = sld [smem:[#allocation7_spill]] (!%p390_p9)  ;;  %v1826_v24 = vld [vmem:[%s2621_s4] ss:$0 sm:$0xff] (!%p390_p9)  ;;  %s2200_s23 = smov (!%p390_p9), 64   ;;  %vm564_vm2 = vcmask (!%p390_p9), 64512   ;;  %v2385_v31 = vshrl.u32 (!%p390_p9), %v552_v30, 7 }
  0x14   : > { %1941 = vmatprep.subr.mxu1 (!%p390_p9), %v2199_v13  ;;  %1943 = vmatprep.mubr.msk.f32.mxu1 (!%p390_p9), %vm2198_vm1, %v2199_v13  ;;  %s2202_s30 = smov (!%p390_p9), 88   ;;  %v2387_v32 = vand.u32 (!%p390_p9), 127, %v552_v30  ;;  %s2203_s15 = smov (!%p390_p9), 120   ;;  %v557_v48 = vld [vmem:[%s2622_s5] sm:$0xff] (!%p390_p9) }
  0x15   : > { %2024 = vmatpush3.bf16.msra.mxu0 (!%p390_p9), %v2023_v11  ;;  %1942 = vmatpush3.msra.mxu1 (!%p390_p9), %v557_v48  ;;  %s2205_s22 = smov (!%p390_p9), 80  }
  0x16   : > { %2025 = vmatprep.subr.bf16.mxu0 (!%p390_p9), %v2197_v10  ;;  %vm556_vm3 = vcmp.ge.s32.totalorder (!%p390_p9), %v2385_v31, %v2387_v32  ;;  %1951 = vmatprep.subr.mxu1 (!%p390_p9), %v2199_v13  ;;  %v560_v31 = vld [vmem:[%s2622_s5 + $0x18] sm:$0xff] (!%p390_p9) }
  0x18   : > { %v1824_v19 = vld [vmem:[%s2637_s1] ss:$0 sm:$0xff] (!%p390_p9) }
  0x19   : > { %s433_s20 = scalar_select %p432_p10, %s2303_s29, 1  ;;  %2027 = vmatpush3.bf16.msra.mxu0 %v2026_v14  ;;  %v1825_v21 = vld [vmem:[%s2638_s2] ss:$0 sm:$0xff] }
  0x1a   : > { %1916 = vmatprep.subr.mxu0 %v2199_v13 }
  0x1b   : > { %s1823_s21 = sshll.u32 %s433_s20, 3  ;;  %s2209_s20 = smov 104  }
  0x1c   : > { %s435_s24 = scalar_lea.vmem %s2636_s0, %s1823_s21  ;;  %s2204_s21 = smov 56  }
  0x1d   : > { %v2335_v0 = vld [vmem:[%s435_s24] sm:$0xff]  ;;  %s2201_s24 = smov 96   ;;  %s1851_s0 = sshll.u32 %s2303_s29, 7 }
  0x1e   : > { %v440_v1 = vsel %vm439_vm0, %v2335_v0, 0.0 }
  0x1f   : > { %441 = vadd.xlane.f32.xlu0 %v440_v1 }
  0xac   : > { %v442_v2 = vpop.xlane.xlu0 %441 }
  0xad   : > { %v444_v3 = vmul.f32 0.03125, %v442_v2 }
  0xaf   : > { %v445_v4 = vsub.f32 %v2335_v0, %v444_v3 }
  0xb1   : > { %v446_v5 = vmul.f32 %v445_v4, %v445_v4 }
  0xb3   : > { %v447_v6 = vsel %vm439_vm0, %v446_v5, 0.0  ;;  %v558_v5 = vld [vmem:[%s2622_s5 + $0x8] sm:$0xff] }
  0xb4   : > { %448 = vadd.xlane.f32.xlu0 %v447_v6 }
 0x141   : > { %v449_v15 = vpop.xlane.xlu0 %448 }
 0x142   : > { %v450_v16 = vmul.f32 0.03125, %v449_v15 }
 0x144   : > { %v451_v17 = vadd.f32 1e-05, %v450_v16 }
 0x146   : > { %2111 = vrsqrt.f32 %v451_v17 }
 0x150   : > { %v2112_v18 = vpop.eup %2111 }
 0x151   : > { %v453_v20 = vmul.f32 %v2112_v18, %v445_v4 }
 0x153   : > { %v460_v22 = vmul.f32 %v1824_v19, %v453_v20 }
 0x155   : > { %v467_v23 = vadd.f32 %v1825_v21, %v460_v22 }
 0x157   : > { %1914 = vmatmul.mubr.msk.f32.vlgmr.msra.gmra.mrb[0].mxu0 %vm439_vm0, %v467_v23 }
 0x158   : > { %1918 = vmatprep.mubr.msk.f32.mxu0 %vm2198_vm1, %v2199_v13 }
 0x22a   : > { %v548_v25 = vpop.f32.mrb[0].mxu0 }
 0x22b   : > { %v2373_v26 = vadd.f32 %v1826_v24, %v548_v25  ;;  %v1915_v27 = vpop.f32.mrb[1].mxu0 }
 0x22d   : > { %652 = vrot.lane.b32.xlu0 %v2373_v26, %s2200_s23  ;;  %562 = vrot.lane.b32.xlu1 %v2373_v26, %s2201_s24  ;;  %s2206_s23 = smov 112   ;;  %s2207_s24 = smov 48  }
 0x231   : > { %730 = vrot.lane.b32.xlu0 %v2373_v26, %s2202_s30  ;;  %s2208_s30 = smov 72  }
 0x29f   : > { %v563_v28 = vpop.permute.xlu1 %562  ;;  %v653_v29 = vpop.permute.xlu0 %652 }
 0x2a0   : > { %1917 = vmatpush3.xpose.msk.msra.mxu0 %vm564_vm2, %v563_v28 }
 0x2a1   : > { %1921 = vmatprep.subr.mxu0 %v2199_v13 }
 0x2a3   : > { %1919 = vmatmul.mubr.msk.f32.vlgmr.msra.gmra.mrb[2].mxu0 %vm564_vm2, %v2373_v26  ;;  %v731_v43 = vpop.permute.xlu0 %730 }
 0x2a4   : > { %1922 = vmatpush3.msra.mxu0 %v653_v29  ;;  %1923 = vmatprep.mubr.msk.f32.mxu0 %vm2198_vm1, %v2199_v13 }
 0x2a5   : > { %1926 = vmatprep.subr.mxu0 %v2199_v13 }
 0x376   : > { %v635_v33 = vpop.f32.mrb[2].mxu0 }
 0x377   : > { %v639_v34 = vmul.f32 0.35355338, %v635_v33  ;;  %v1920_v35 = vpop.f32.mrb[3].mxu0  ;;  %v559_v33 = vld [vmem:[%s2622_s5 + $0x10] sm:$0xff] }
 0x379   : > { %v640_v36 = vsel %vm556_vm3, %v639_v34, -1e+30 }
 0x37a   : > { %v641_v37 = vsel %vm564_vm2, %v640_v36, -inf }
 0x37b   : > { %642 = vmax.xlane.f32.xlu1 %v641_v37 }
 0x408   : > { %v643_v38 = vpop.xlane.xlu1 %642 }
 0x409   : > { %v644_v39 = vsub.f32 %v640_v36, %v643_v38 }
 0x40b   : > { %v645_v40 = vmul.f32 1.442695, %v644_v39 }
 0x40d   : > { %2113 = vpow2.f32 %v645_v40 }
 0x417   : > { %v2114_v41 = vpop.eup %2113 }
 0x418   : > { %v647_v42 = vsel %vm564_vm2, %v2114_v41, 0.0 }
 0x419   : > { %648 = vadd.xlane.f32.xlu0 %v647_v42 }
 0x42f   : > { %728 = vrot.lane.b32.xlu0 %v2373_v26, %s2203_s15  ;;  %s429_s15 = sand.u32 1, %s2187_s26  }
 0x430   : > { %s1822_s16 = sshll.u32 %s429_s15, 3 }
 0x431   : > { %s431_s1 = scalar_lea.vmem [#allocation2], %s1822_s16  ;;  %s2211_s16 = smov [#allocation2]  }
 0x4a6   : > { %v649_v44 = vpop.xlane.xlu0 %648 }
 0x4a7   : > { %2115 = vrcp.f32 %v649_v44 }
 0x4aa   : > { %v729_v47 = vpop.permute.xlu0 %728 }
 0x4b1   : > { %v2116_v45 = vpop.eup %2115 }
 0x4b2   : > { %v651_v46 = vmul.f32 %v2116_v45, %v2114_v41 }
 0x4b4   : > { %1924 = vmatmul.mubr.msk.f32.vlgmr.msra.gmra.mrb[4].mxu0 %vm564_vm2, %v651_v46 }
 0x4b5   : > { %1927 = vmatpush3.xpose.msk.msra.mxu0 %vm564_vm2, %v731_v43  ;;  %1928 = vmatprep.mubr.msk.f32.mxu0 %vm2198_vm1, %v2199_v13 }
 0x4b6   : > { %1931 = vmatprep.subr.mxu0 %v2199_v13 }
 0x4b8   : > { %1929 = vmatmul.mubr.msk.f32.vlgmr.msra.gmra.mrb[6].mxu0 %vm564_vm2, %v729_v47 }
 0x4b9   : > { %1933 = vmatprep.mubr.msk.f32.mxu0 %vm2198_vm1, %v2199_v13 }
 0x587   : > { %v724_v49 = vpop.f32.mrb[4].mxu0 }
 0x588   : > { %v1925_v50 = vpop.f32.mrb[5].mxu0  ;;  %1944 = vmatmul.mubr.msk.f32.vlgmr.msra.gmra.mrb[0].mxu1 %vm564_vm2, %v724_v49 }
 0x589   : > { %1953 = vmatprep.mubr.msk.f32.mxu1 %vm2198_vm1, %v2199_v13 }
 0x58b   : > { %v802_v51 = vpop.f32.mrb[6].mxu0 }
 0x58c   : > { %v806_v52 = vmul.f32 0.35355338, %v802_v51  ;;  %v1930_v53 = vpop.f32.mrb[7].mxu0 }
 0x58e   : > { %v807_v54 = vsel %vm556_vm3, %v806_v52, -1e+30 }
 0x58f   : > { %v808_v55 = vsel %vm564_vm2, %v807_v54, -inf }
 0x590   : > { %809 = vmax.xlane.f32.xlu1 %v808_v55 }
 0x5a1   : > { %819 = vrot.lane.b32.xlu1 %v2373_v26, %s2204_s21  ;;  %s2137_s21 = sshll.u32 %s2211_s16, 4  ;;  %s2138_s21 = int_to_ptr.vmem [resolvable:$false] %s2137_s21 }
 0x5a2   : > { %s2139_s2 = scalar_lea.vmem %s2138_s21, 256 }
 0x5a5   : > { %1043 = vrot.lane.b32.xlu1 %v2373_v26, %s2205_s22  ;;  %s1759_s22 = sshll.u32 %s431_s1, 4  ;;  %s2576_s22 = int_to_ptr.vmem [resolvable:$true] %s1759_s22 }
 0x5a6   : > { %s2133_s29 = scalar_lea.vmem %s2576_s22, 128  ;;  %p2140_p0 = scmp.lt.s32.totalorder %s2576_s22, %s2138_s21 }
 0x5a7   : > { %p2134_p11 = scmp.ne.s32.totalorder %s2576_s22, %s2133_s29  ;;  %p2141_p1 = scmp.lt.s32.totalorder %s2139_s2, %s2133_s29 }
 0x5a9   : > { %1041 = vrot.lane.b32.xlu1 %v2373_v26, %s2206_s23  ;;  %s2210_s23 = smov 40   ;;  %p2135_p12 = pnand %p2134_p11, %p2320_p5 }
 0x5aa   : > { %p2142_p2 = por %p2141_p1, %p2140_p0 }
 0x5ab   : > { %p2136_p13 = pneg %p2135_p12 }
 0x5ad   : > { %p2143_p3 = pnand %p2142_p2, %p2136_p13 }
 0x61d   : > { %v810_v56 = vpop.xlane.xlu1 %809 }
 0x61e   : > { %v811_v57 = vsub.f32 %v807_v54, %v810_v56  ;;  %v1844_v56 = vld [vmem:[%s2623_s6] ss:$0 sm:$0xff] }
 0x620   : > { %v812_v58 = vmul.f32 1.442695, %v811_v57 }
 0x621   : > { %v820_v59 = vpop.permute.xlu1 %819 }
 0x622   : > { %2117 = vpow2.f32 %v812_v58  ;;  %1932 = vmatpush3.msra.mxu0 %v820_v59 }
 0x623   : > { %1936 = vmatprep.subr.mxu0 %v2199_v13 }
 0x625   : > { %v1044_v6 = vpop.permute.xlu1 %1043 }
 0x629   : > { %v1042_v9 = vpop.permute.xlu1 %1041 }
 0x62c   : > { %v2118_v60 = vpop.eup %2117 }
 0x62d   : > { %v814_v61 = vsel %vm564_vm2, %v2118_v60, 0.0 }
 0x62e   : > { %815 = vadd.xlane.f32.xlu0 %v814_v61 }
 0x644   : > { %1132 = vrot.lane.b32.xlu0 %v2373_v26, %s2207_s24 }
 0x648   : > { %1284 = vrot.lane.b32.xlu0 %v2373_v26, %s2208_s30  ;;  %s2574_s30 = scalar_lea.hbm %s2630_s13, %s1851_s0 }
 0x65b   : > { %v1037_v62 = vpop.f32.mrb[0].mxu1 }
 0x65c   : > { %v1945_v63 = vpop.f32.mrb[1].mxu1 }
 0x6bb   : > { %v816_v1 = vpop.xlane.xlu0 %815 }
 0x6bc   : > { %2119 = vrcp.f32 %v816_v1  ;;  %v1561_v1 = vld [vmem:[%s2626_s9] sm:$0xff] }
 0x6bf   : > { %v1133_v2 = vpop.permute.xlu0 %1132 }
 0x6c0   : > { %1952 = vmatpush3.msra.mxu1 %v1133_v2 }
 0x6c1   : > { %1961 = vmatprep.subr.mxu1 %v2199_v13 }
 0x6c3   : > { %v1285_v25 = vpop.permute.xlu0 %1284 }
 0x6c6   : > { %v2120_v3 = vpop.eup %2119 }
 0x6c7   : > { %v818_v4 = vmul.f32 %v2120_v3, %v2118_v60  ;;  %v1563_v3 = vld [vmem:[%s2626_s9 + $0x10] sm:$0xff] }
 0x6c9   : > { %1934 = vmatmul.mubr.msk.f32.vlgmr.msra.gmra.mrb[8].mxu0 %vm564_vm2, %v818_v4  ;;  %v1564_v4 = vld [vmem:[%s2626_s9 + $0x18] sm:$0xff] }
 0x6ca   : > { %1937 = vmatpush3.msra.mxu0 %v558_v5  ;;  %1938 = vmatprep.mubr.msk.f32.mxu0 %vm2198_vm1, %v2199_v13  ;;  %v2032_v5 = vpack.c.bf16 %v1564_v4, %v1563_v3 }
 0x6cb   : > { %1946 = vmatprep.subr.mxu0 %v2199_v13 }
 0x79c   : > { %v891_v7 = vpop.f32.mrb[8].mxu0 }
 0x79d   : > { %v1935_v8 = vpop.f32.mrb[9].mxu0  ;;  %1939 = vmatmul.mubr.msk.f32.vlgmr.msra.gmra.mrb[10].mxu0 %vm564_vm2, %v891_v7  ;;  %v1651_v7 = vld [vmem:[%s2628_s11 + $0x8] sm:$0xff] }
 0x79e   : > { %1947 = vmatpush3.xpose.msk.msra.mxu0 %vm564_vm2, %v1044_v6  ;;  %1948 = vmatprep.mubr.msk.f32.mxu0 %vm2198_vm1, %v2199_v13  ;;  %v1650_v6 = vld [vmem:[%s2628_s11] sm:$0xff]  ;;  %v1652_v8 = vld [vmem:[%s2628_s11 + $0x10] sm:$0xff] }
 0x79f   : > { %1956 = vmatprep.subr.mxu0 %v2199_v13 }
 0x7a1   : > { %1949 = vmatmul.mubr.msk.f32.vlgmr.msra.gmra.mrb[12].mxu0 %vm564_vm2, %v1042_v9  ;;  %v2035_v9 = vpack.c.bf16 %v1651_v7, %v1650_v6 }
 0x7a2   : > { %1958 = vmatprep.mubr.msk.f32.mxu0 %vm2198_vm1, %v2199_v13  ;;  %1957 = vmatpush3.msra.mxu0 %v559_v33  ;;  %v1659_v33 = vld [vmem:[%s2628_s11 + $0x48] sm:$0xff] }
 0x7a3   : > { %1966 = vmatprep.subr.mxu0 %v2199_v13 }
 0x870   : > { %v964_v11 = vpop.f32.mrb[10].mxu0 }
 0x871   : > { %v1038_v12 = vadd.f32 %v1037_v62, %v964_v11  ;;  %v1940_v14 = vpop.f32.mrb[11].mxu0  ;;  %v1653_v11 = vld [vmem:[%s2628_s11 + $0x18] sm:$0xff] }
 0x872   : > { %v1654_v14 = vld [vmem:[%s2628_s11 + $0x20] sm:$0xff] }
 0x874   : > { %v1115_v15 = vpop.f32.mrb[12].mxu0 }
 0x875   : > { %v1119_v16 = vmul.f32 0.35355338, %v1115_v15  ;;  %v1950_v17 = vpop.f32.mrb[13].mxu0  ;;  %v1655_v15 = vld [vmem:[%s2628_s11 + $0x28] sm:$0xff] }
 0x877   : > { %v1120_v18 = vsel %vm556_vm3, %v1119_v16, -1e+30  ;;  %v2041_v16 = vpack.c.bf16 %v1655_v15, %v1654_v14 }
 0x878   : > { %v1121_v19 = vsel %vm564_vm2, %v1120_v18, -inf }
 0x879   : > { %1122 = vmax.xlane.f32.xlu1 %v1121_v19 }
 0x906   : > { %v1123_v20 = vpop.xlane.xlu1 %1122 }
 0x907   : > { %v1124_v21 = vsub.f32 %v1120_v18, %v1123_v20 }
 0x909   : > { %v1125_v22 = vmul.f32 1.442695, %v1124_v21  ;;  %v1845_v21 = vld [vmem:[%s2624_s7] ss:$0 sm:$0xff] }
 0x90b   : > { %2121 = vpow2.f32 %v1125_v22 }
 0x915   : > { %v2122_v23 = vpop.eup %2121 }
 0x916   : > { %v1127_v24 = vsel %vm564_vm2, %v2122_v23, 0.0 }
 0x917   : > { %1128 = vadd.xlane.f32.xlu0 %v1127_v24 }
 0x92d   : > { %1282 = vrot.lane.b32.xlu0 %v2373_v26, %s2209_s20  ;;  %s1746_s20 = scalar_lea.sflag [#allocation3], %s429_s15 }
 0x9a4   : > { %v1129_v27 = vpop.xlane.xlu0 %1128 }
 0x9a5   : > { %2123 = vrcp.f32 %v1129_v27  ;;  %v1656_v27 = vld [vmem:[%s2628_s11 + $0x30] sm:$0xff] }
 0x9a8   : > { %v1283_v30 = vpop.permute.xlu0 %1282 }
 0x9af   : > { %v2124_v28 = vpop.eup %2123 }
 0x9b0   : > { %v1131_v29 = vmul.f32 %v2124_v28, %v2122_v23  ;;  %v1846_v23 = vld [vmem:[%s2625_s8] ss:$0 sm:$0xff]  ;;  %v1657_v28 = vld [vmem:[%s2628_s11 + $0x38] sm:$0xff] }
 0x9b2   : > { %1954 = vmatmul.mubr.msk.f32.vlgmr.msra.gmra.mrb[2].mxu1 %vm564_vm2, %v1131_v29  ;;  %v2044_v29 = vpack.c.bf16 %v1657_v28, %v1656_v27 }
 0x9b3   : > { %1962 = vmatpush3.xpose.msk.msra.mxu1 %vm564_vm2, %v1285_v25  ;;  %1963 = vmatprep.mubr.msk.f32.mxu1 %vm2198_vm1, %v2199_v13 }
 0x9b4   : > { %1971 = vmatprep.subr.mxu1 %v2199_v13 }
 0x9b6   : > { %1964 = vmatmul.mubr.msk.f32.vlgmr.msra.gmra.mrb[4].mxu1 %vm564_vm2, %v1283_v30  ;;  %v1658_v30 = vld [vmem:[%s2628_s11 + $0x40] sm:$0xff] }
 0x9b7   : > { %1973 = vmatprep.mubr.msk.f32.mxu1 %vm2198_vm1, %v2199_v13  ;;  %1972 = vmatpush3.msra.mxu1 %v560_v31 }
 0x9b8   : > { %2034 = vmatprep.subr.bf16.mxu1 %v2197_v10 }
 0xa85   : > { %v1204_v34 = vpop.f32.mrb[2].mxu1 }
 0xa86   : > { %v1955_v35 = vpop.f32.mrb[3].mxu1  ;;  %1959 = vmatmul.mubr.msk.f32.vlgmr.msra.gmra.mrb[14].mxu0 %vm564_vm2, %v1204_v34  ;;  %v2047_v34 = vpack.c.bf16 %v1659_v33, %v1658_v30 }
 0xa87   : > { %1968 = vmatprep.mubr.msk.f32.mxu0 %vm2198_vm1, %v2199_v13  ;;  %v1660_v35 = vld [vmem:[%s2628_s11 + $0x50] sm:$0xff] }
 0xa89   : > { %v1356_v36 = vpop.f32.mrb[4].mxu1 }
 0xa8a   : > { %v1360_v37 = vmul.f32 0.35355338, %v1356_v36  ;;  %v1965_v38 = vpop.f32.mrb[5].mxu1  ;;  %v1661_v36 = vld [vmem:[%s2628_s11 + $0x58] sm:$0xff] }
 0xa8b   : > { %v1662_v38 = vld [vmem:[%s2628_s11 + $0x60] sm:$0xff] }
 0xa8c   : > { %v1361_v39 = vsel %vm556_vm3, %v1360_v37, -1e+30  ;;  %v2050_v37 = vpack.c.bf16 %v1661_v36, %v1660_v35 }
 0xa8d   : > { %v1362_v40 = vsel %vm564_vm2, %v1361_v39, -inf }
 0xa8e   : > { %1363 = vmax.xlane.f32.xlu1 %v1362_v40 }
 0xa9f   : > { %1373 = vrot.lane.b32.xlu1 %v2373_v26, %s2210_s23 }
 0xb1b   : > { %v1364_v41 = vpop.xlane.xlu1 %1363 }
 0xb1c   : > { %v1365_v42 = vsub.f32 %v1361_v39, %v1364_v41  ;;  %v1663_v39 = vld [vmem:[%s2628_s11 + $0x68] sm:$0xff]  ;;  %v1664_v41 = vld [vmem:[%s2628_s11 + $0x70] sm:$0xff] }
 0xb1d   : > { %v2053_v40 = vpack.c.bf16 %v1663_v39, %v1662_v38 }
 0xb1e   : > { %v1366_v43 = vmul.f32 1.442695, %v1365_v42  ;;  %v1665_v42 = vld [vmem:[%s2628_s11 + $0x78] sm:$0xff] }
 0xb1f   : > { %v1374_v44 = vpop.permute.xlu1 %1373 }
 0xb20   : > { %2125 = vpow2.f32 %v1366_v43  ;;  %1967 = vmatpush3.msra.mxu0 %v1374_v44  ;;  %v2056_v43 = vpack.c.bf16 %v1665_v42, %v1664_v41  ;;  %v1847_v44 = vld [vmem:[%s2627_s10] ss:$0 sm:$0xff] }
 0xb21   : > { %2028 = vmatprep.subr.bf16.mxu0 %v2197_v10 }
 0xb2a   : > { %v2126_v45 = vpop.eup %2125 }
 0xb2b   : > { %v1368_v46 = vsel %vm564_vm2, %v2126_v45, 0.0 }
 0xb2c   : > { %1369 = vadd.xlane.f32.xlu0 %v1368_v46 }
 0xb59   : > { %v1277_v26 = vpop.f32.mrb[14].mxu0 }
 0xb5a   : > { %v1281_v32 = vadd.f32 %v1277_v26, %v1038_v12  ;;  %v1960_v47 = vpop.f32.mrb[15].mxu0  ;;  %v2038_v12 = vpack.c.bf16 %v1653_v11, %v1652_v8 }
 0xbb9   : > { %v1370_v48 = vpop.xlane.xlu0 %1369 }
 0xbba   : > { %2127 = vrcp.f32 %v1370_v48 }
 0xbc4   : > { %v2128_v49 = vpop.eup %2127 }
 0xbc5   : > { %v1372_v50 = vmul.f32 %v2128_v49, %v2126_v45  ;;  %v1849_v49 = vld [vmem:[%s2629_s12] ss:$0 sm:$0xff] }
 0xbc7   : > { %1969 = vmatmul.mubr.msk.f32.vlgmr.msra.gmra.mrb[16].mxu0 %vm564_vm2, %v1372_v50 }
 0xbc8   : > { %1984 = vmatprep.mubr.msk.f32.mxu0 %vm2198_vm1, %v2199_v13 }
 0xc9a   : > { %v1445_v51 = vpop.f32.mrb[16].mxu0 }
 0xc9b   : > { %v1970_v52 = vpop.f32.mrb[17].mxu0  ;;  %1974 = vmatmul.mubr.msk.f32.vlgmr.msra.gmra.mrb[6].mxu1 %vm564_vm2, %v1445_v51 }
 0xc9c   : > { %2019 = vmatprep.mubr.msk.f32.mxu1 %vm2198_vm1, %v2199_v13  ;;  %2036 = vmatpush3.bf16.msra.mxu1 %v2035_v9 }
 0xc9d   : > { %2037 = vmatprep.subr.bf16.mxu1 %v2197_v10 }
 0xca0   : > { %2039 = vmatpush3.bf16.msra.mxu1 %v2038_v12 }
 0xca1   : > { %2040 = vmatprep.subr.bf16.mxu1 %v2197_v10 }
 0xca4   : > { %2042 = vmatpush3.bf16.msra.mxu1 %v2041_v16 }
 0xca5   : > { %2043 = vmatprep.subr.bf16.mxu1 %v2197_v10 }
 0xca8   : > { %2045 = vmatpush3.bf16.msra.mxu1 %v2044_v29 }
 0xca9   : > { %2046 = vmatprep.subr.bf16.mxu1 %v2197_v10 }
 0xcac   : > { %2048 = vmatpush3.bf16.msra.mxu1 %v2047_v34 }
 0xcad   : > { %2049 = vmatprep.subr.bf16.mxu1 %v2197_v10 }
 0xcb0   : > { %2051 = vmatpush3.bf16.msra.mxu1 %v2050_v37 }
 0xcb1   : > { %2052 = vmatprep.subr.bf16.mxu1 %v2197_v10 }
 0xcb4   : > { %2054 = vmatpush3.bf16.msra.mxu1 %v2053_v40 }
 0xcb5   : > { %2055 = vmatprep.subr.bf16.mxu1 %v2197_v10 }
 0xcb8   : > { %2057 = vmatpush3.bf16.msra.mxu1 %v2056_v43 }
 0xd6e   : > { %v1518_v53 = vpop.f32.mrb[6].mxu1 }
 0xd6f   : > { %v1522_v54 = vadd.f32 %v1518_v53, %v1281_v32  ;;  %v1975_v55 = vpop.f32.mrb[7].mxu1 }
 0xd71   : > { %v1523_v57 = vadd.f32 %v1522_v54, %v2335_v0  ;;  %v1562_v0 = vld [vmem:[%s2626_s9 + $0x8] sm:$0xff] }
 0xd72   : > { %v2029_v2 = vpack.c.bf16 %v1562_v0, %v1561_v1 }
 0xd73   : > { %v2481_v58 = vadd.f32 %v1844_v56, %v1523_v57 }
 0xd74   : > { %2030 = vmatpush3.bf16.msra.mxu0 %v2029_v2 }
 0xd75   : > { %v1534_v59 = vsel %vm439_vm0, %v2481_v58, 0.0  ;;  %2031 = vmatprep.subr.bf16.mxu0 %v2197_v10 }
 0xd76   : > { %1535 = vadd.xlane.f32.xlu1 %v1534_v59 }
 0xd78   : > { %2033 = vmatpush3.bf16.msra.mxu0 %v2032_v5 }
 0xe03   : > { %v1536_v60 = vpop.xlane.xlu1 %1535 }
 0xe04   : > { %v1537_v61 = vmul.f32 0.03125, %v1536_v60 }
 0xe06   : > { %v1538_v62 = vsub.f32 %v2481_v58, %v1537_v61 }
 0xe08   : > { %v1539_v13 = vmul.f32 %v1538_v62, %v1538_v62 }
 0xe0a   : > { %v1540_v63 = vsel %vm439_vm0, %v1539_v13, 0.0 }
 0xe0b   : > { %1541 = vadd.xlane.f32.xlu0 %v1540_v63 }
 0xe98   : > { %v1542_v17 = vpop.xlane.xlu0 %1541 }
 0xe99   : > { %v1543_v18 = vmul.f32 0.03125, %v1542_v17 }
 0xe9b   : > { %v1544_v19 = vadd.f32 1e-05, %v1543_v18 }
 0xe9d   : > { %2129 = vrsqrt.f32 %v1544_v19 }
 0xea7   : > { %v2130_v20 = vpop.eup %2129 }
 0xea8   : > { %v1546_v22 = vmul.f32 %v2130_v20, %v1538_v62 }
 0xeaa   : > { %v1553_v24 = vmul.f32 %v1845_v21, %v1546_v22 }
 0xeac   : > { %v1560_v25 = vadd.f32 %v1846_v23, %v1553_v24 }
 0xeae   : > { %1985 = vmatmul.mubr.msk.f32.vlgmr.msra.gmra.mrb[18].mxu0 %vm439_vm0, %v1560_v25 }
 0xf81   : > { %v1641_v45 = vpop.f32.mrb[18].mxu0 }
 0xf82   : > { %v1642_v46 = vadd.f32 %v1847_v44, %v1641_v45  ;;  %v1986_v31 = vpop.f32.mrb[19].mxu0 }
 0xf84   : > { %v1646_v10 = vmul.f32 0.70710677, %v1642_v46  ;;  %v1645_v32 = vmul.f32 0.5, %v1642_v46 }
 0xf86   : > { %2131 = verf.f32 %v1646_v10 }
 0xf90   : > { %v2132_v26 = vpop.eup %2131 }
 0xf91   : > { %v1648_v47 = vadd.f32 1.0, %v2132_v26 }
 0xf93   : > { %v1649_v48 = vmul.f32 %v1648_v47, %v1645_v32 }
 0xf95   : > { %2020 = vmatmul.mubr.f32.vlgmr.msra.gmra.mrb[8].mxu1 %v1649_v48 }
0x1068   : > { %v1739_v50 = vpop.f32.mrb[8].mxu1 }
0x1069   : > { %v1740_v51 = vadd.f32 %v1849_v49, %v1739_v50  ;;  %v2021_v52 = vpop.f32.mrb[9].mxu1 }
0x106b   : > { %v1743_v53 = vadd.f32 %v1740_v51, %v2481_v58 }
0x106d   : > { %1744 = vst.msk [vmem:[%s431_s1] sm:$0xff] %vm439_vm0, %v1743_v53 }
0x106e   : > { %2146 = shalt.err (!%p2143_p3)
}
0x106f   : > { %s2147_s15 = scalar_lea.hbm %s2574_s30, 128  ;;  %s2151_s23 = scalar_lea.hbm %s2630_s13, 256 }
0x1070   : > { %p2148_p4 = scmp.ne.s32.totalorder %s2574_s30, %s2147_s15  ;;  %p2152_p9 = scmp.lt.u32.totalorder %s2574_s30, %s2630_s13 }
0x1071   : > { %p2153_p10 = scmp.lt.u32.totalorder %s2151_s23, %s2147_s15  ;;  %p2155_p12 = scmp.lt.u32.totalorder %s2147_s15, %s2574_s30 }
0x1072   : > { %p2149_p7 = pnand %p2148_p4, %p2320_p5 }
0x1073   : > { %p2154_p11 = por %p2153_p10, %p2152_p9 }
0x1074   : > { %p2150_p8 = pneg %p2149_p7 }
0x1075   : > { %p2156_p13 = por %p2155_p12, %p2154_p11 }
0x1077   : > { %p2157_p0 = pnand %p2156_p13, %p2150_p8 }
0x1079   : > { %2160 = shalt.err (!%p2157_p0)
}
0x107a   : > { %2058 = dma.vmem_to_hbm [thread:$0]  (%p2320_p5), %s2576_s22, 128, %s2574_s30, %s1746_s20  }
0x107b PF: > { %p2064_p1 = scmp.ge.s32.totalorder %s2195_s28, 2  ;;  %s1771_s2 = sand.u32 1, %s2183_s25  }
0x107c   : > { %s1772_s29 = scalar_lea.sflag [#allocation3], %s1771_s2 }
0x107d   : > { %p2061_p2 = pnand %p2064_p1, %p2324_p6 }
0x107f   : > { %2178 = dma.done.wait (!%p2061_p2), %s1772_s29, 128  }
0x1080   : > { %2180 = vsyncadd (!%p2061_p2), %s1772_s29, 4294967168  ;;  %p23_p3 = scmp.ge.s32.totalorder %s2307_s14, 4   ;;  %s2639_s25 = smov %s2187_s26 }
0x1081   : > { %s2640_s26 = smov %s2191_s27  ;;  %s2641_s27 = smov %s2318_s17 }
0x1082   : > { %s2642_s28 = smov %s2307_s14  ;;  %25 = sbr.rel (!%p23_p3) target bundleno = 7 (0x7), region = 107 }
0x1089   :  { %1777 = vsyncpa [#allocation3], 1 }
0x108a   :  { %1779 = vsyncpa [#allocation3 + $0x1], 1 }

</bundles_post_ra>
